<compile_context>
chip_gen: v6e
topology: v6e:2x2x1
jax: 0.10.0
libtpu: 0.0.40
codegen_flags: <defaults>
</compile_context>

<pallas_src>
import numpy as np
import jax
import jax.numpy as jnp
from jax.experimental import pallas as pl
from jax.experimental.pallas import tpu as pltpu

# ---- static network dimensions implied by the module ----
L_IN = 49            # fc1 expects 120 = 3*40 -> L2 = 40 -> L1 = 45 -> L_IN = 49
C0, C1, C2 = 1, 2, 3
K1, K2 = 5, 6
L1 = L_IN - K1 + 1   # 45
L2 = L1 - K2 + 1     # 40
F_FLAT = C2 * L2     # 120
H = 100
N_OUT = 2
TILE_B = 8           # samples per grid step (one full sublane tile)

# ---- SMEM scalar-table layout (conv weights/biases, 51 floats) ----
S_W1 = 0                         # 10: w1[c*K1 + k]
S_B1 = S_W1 + C1 * K1            # 2
S_W2 = S_B1 + C1                 # 36: w2[c2*(C1*K2) + ci*K2 + k]
S_B2 = S_W2 + C2 * C1 * K2       # 3
S_LEN = 64

# ---- VMEM (8,128) param-slab layout ----
# rows 0..2  : fused FC weights for logit 0, reshaped (3, 40) in lanes 0..39
# rows 3..5  : fused FC weights for logit 1, reshaped (3, 40) in lanes 0..39
# row  6     : fused FC bias in lanes 0..1, zeros elsewhere
R_BF = 6


def cnn1d_kernel(s_ref, x_ref, p_ref, out_ref):
    # s_ref: (64,)   f32 SMEM    x_ref: (8,128) f32 VMEM
    # p_ref: (8,128) f32 VMEM    out_ref: (8,128) f32 VMEM
    x = x_ref[...]                                             # 8 samples/rows

    # --- layer1: Conv1d(1->2, k=5) + ReLU (scalar-broadcast MACs) ---
    xs = [x[:, k:k + L1] for k in range(K1)]                   # 5 shifted (8,45)
    h1 = []
    for c in range(C1):
        acc = xs[0] * s_ref[S_W1 + c * K1] + s_ref[S_B1 + c]   # bias folded in
        for k in range(1, K1):
            acc = acc + xs[k] * s_ref[S_W1 + c * K1 + k]
        h1.append(jnp.maximum(acc, 0.0))                       # (8, L1)

    # --- layer2: Conv1d(2->3, k=6) + ReLU ---
    h1s = [[h1[ci][:, k:k + L2] for k in range(K2)] for ci in range(C1)]
    h2 = []
    for c in range(C2):
        base = S_W2 + c * (C1 * K2)
        acc = h1s[0][0] * s_ref[base] + s_ref[S_B2 + c]        # bias folded in
        for ci in range(C1):
            for k in range(K2):
                if ci == 0 and k == 0:
                    continue
                acc = acc + h1s[ci][k] * s_ref[base + ci * K2 + k]
        h2.append(jnp.maximum(acc, 0.0))                       # (8, L2)

    # --- fused fc1∘fc2 (exact offline fold; VPU mul + XLU lane reduce) ---
    prod0 = h2[0] * p_ref[0:1, 0:L2]
    prod1 = h2[0] * p_ref[C2:C2 + 1, 0:L2]
    for c in range(1, C2):
        prod0 = prod0 + h2[c] * p_ref[c:c + 1, 0:L2]
        prod1 = prod1 + h2[c] * p_ref[C2 + c:C2 + c + 1, 0:L2]
    o0 = jnp.sum(prod0, axis=1, keepdims=True)                 # (8, 1)
    o1 = jnp.sum(prod1, axis=1, keepdims=True)                 # (8, 1)
    # (The two reduces can't be merged here: every sublane row is a distinct
    #  sample, so each logit needs its own cross-lane reduction.)

    bias_row = p_ref[R_BF:R_BF + 1, :]                         # (1, 128)
    lane = jax.lax.broadcasted_iota(jnp.int32, (TILE_B, 128), 1)
    out_ref[...] = (bias_row
                    + jnp.where(lane == 0, o0, 0.0)
                    + jnp.where(lane == 1, o1, 0.0))           # full (8,128) store


def prepare_params(w1, b1, w2, b2, wf1, bf1, wf2, bf2):
    """Run ONCE at weight-load time: fold fc1+fc2 in float64 (exact, tighter than
    f32) and pack into one (8,128) VMEM slab + one (64,) SMEM scalar table."""
    w1 = np.asarray(w1, np.float64); b1 = np.asarray(b1, np.float64)
    w2 = np.asarray(w2, np.float64); b2 = np.asarray(b2, np.float64)
    wf1 = np.asarray(wf1, np.float64); bf1 = np.asarray(bf1, np.float64)
    wf2 = np.asarray(wf2, np.float64); bf2 = np.asarray(bf2, np.float64)

    w_fused = wf1.T @ wf2.T                       # (120, 2)  (no ReLU between FCs)
    b_fused = bf1 @ wf2.T + bf2                   # (2,)
    # PyTorch flatten is channel-major: flat index f = c*L2 + t
    wfa = w_fused[:, 0].reshape(C2, L2)
    wfb = w_fused[:, 1].reshape(C2, L2)

    p = np.zeros((8, 128), np.float32)
    p[0:C2, 0:L2] = wfa
    p[C2:2 * C2, 0:L2] = wfb
    p[R_BF, 0:N_OUT] = b_fused

    s = np.zeros((S_LEN,), np.float32)
    s[S_W1:S_W1 + C1 * K1] = w1.reshape(-1)       # c*K1 + k
    s[S_B1:S_B1 + C1] = b1
    s[S_W2:S_W2 + C2 * C1 * K2] = w2.reshape(-1)  # c2*(C1*K2) + ci*K2 + k
    s[S_B2:S_B2 + C2] = b2
    return jnp.asarray(p), jnp.asarray(s)


@jax.jit
def mycnn1d_forward(x, packed_vmem, packed_smem):
    """x: (B, 1, L_IN) float32 (PyTorch NCL), B independent single-sample
    forwards of the module. Returns (B, 2)."""
    B = x.shape[0]
    Bp = ((B + TILE_B - 1) // TILE_B) * TILE_B
    # lane-dense, tile-padded input: (Bp, 128), signal in lanes 0..48
    x2 = jnp.zeros((Bp, 128), jnp.float32).at[:B, :L_IN].set(x.reshape(B, L_IN))

    out = pl.pallas_call(
        cnn1d_kernel,
        out_shape=jax.ShapeDtypeStruct((Bp, 128), jnp.float32),
        grid_spec=pltpu.PrefetchScalarGridSpec(
            num_scalar_prefetch=0,
            grid=(Bp // TILE_B,),
            in_specs=[
                pl.BlockSpec(memory_space=pltpu.MemorySpace.SMEM),  # conv scalars
                pl.BlockSpec((TILE_B, 128), lambda i: (i, 0)),      # x tile / step
                pl.BlockSpec((8, 128), lambda i: (0, 0)),           # resident params
            ],
            out_specs=pl.BlockSpec((TILE_B, 128), lambda i: (i, 0)),
        ),
        compiler_params=pltpu.CompilerParams(
            dimension_semantics=("parallel",)),                     # v7x 2-TC split
    )(packed_smem, x2, packed_vmem)
    return out[:B, :N_OUT]


def ref_forward(x, w1, b1, w2, b2, wf1, bf1, wf2, bf2):
    """Pure-JAX reference mirroring the PyTorch forward (unfused weights),
    applied per sample over the batch."""
    dn = ('NCH', 'OIH', 'NCH')
    h1 = jax.lax.conv_general_dilated(
        x, w1, (1,), 'VALID',
        dimension_numbers=jax.lax.conv_dimension_numbers(x.shape, w1.shape, dn))
    h1 = jnp.maximum(h1 + b1[None, :, None], 0.0)
    h2 = jax.lax.conv_general_dilated(
        h1, w2, (1,), 'VALID',
        dimension_numbers=jax.lax.conv_dimension_numbers(h1.shape, w2.shape, dn))
    h2 = jnp.maximum(h2 + b2[None, :, None], 0.0)
    flat = h2.reshape(x.shape[0], -1)
    f1 = flat @ wf1.T + bf1[None, :]
    return f1 @ wf2.T + bf2[None, :]


def init_params(key):
    """Deterministic PyTorch-default-style init: U(-1/sqrt(fan_in), +...)."""
    ks = jax.random.split(key, 8)

    def u(k, shape, fan_in):
        bound = 1.0 / jnp.sqrt(float(fan_in))
        return jax.random.uniform(k, shape, jnp.float32, -bound, bound)

    w1 = u(ks[0], (C1, C0, K1), C0 * K1)
    b1 = u(ks[1], (C1,), C0 * K1)
    w2 = u(ks[2], (C2, C1, K2), C1 * K2)
    b2 = u(ks[3], (C2,), C1 * K2)
    wf1 = u(ks[4], (H, F_FLAT), F_FLAT)
    bf1 = u(ks[5], (H,), F_FLAT)
    wf2 = u(ks[6], (N_OUT, H), H)
    bf2 = u(ks[7], (N_OUT,), H)
    return w1, b1, w2, b2, wf1, bf1, wf2, bf2


if __name__ == "__main__":
    key = jax.random.PRNGKey(0)
    k_x, k_p = jax.random.split(key)
    B = 16                                                   # 2 grid steps of 8
    x = jax.random.normal(k_x, (B, C0, L_IN), jnp.float32)   # NCL, like PyTorch
    params = init_params(k_p)

    packed_vmem, packed_smem = prepare_params(*params)       # offline prep (once)
    out = mycnn1d_forward(x, packed_vmem, packed_smem)
    out = jax.block_until_ready(out)

    ref = ref_forward(x, *params)
    assert out.shape == (B, N_OUT)
    assert jnp.allclose(out, ref, atol=1e-4, rtol=1e-4), (out, ref)
    print("KERNEL_OK")
</pallas_src>

<mosaic_0001>
module attributes {stable_mosaic.version = 11 : i64} {
  func.func @cnn1d_kernel(%arg0: i32, %arg1: memref<64xf32, #tpu.memory_space<smem>>, %arg2: memref<8x128xf32, #tpu.memory_space<vmem>>, %arg3: memref<8x128xf32, #tpu.memory_space<vmem>>, %arg4: memref<8x128xf32, #tpu.memory_space<vmem>>) attributes {dimension_semantics = [#tpu.dimension_semantics<parallel>], iteration_bounds = array<i64: 2>, scalar_prefetch = 0 : i64, scratch_operands = 0 : i64, tpu.core_type = #tpu.core_type<tc>, window_params = [{transform_indices = @transform_0, window_bounds = array<i64: 64>}, {transform_indices = @transform_1, window_bounds = array<i64: 8, 128>}, {pipeline_mode = #tpu.pipeline_mode<synchronous>, transform_indices = @transform_2, window_bounds = array<i64: 8, 128>}, {transform_indices = @transform_3, window_bounds = array<i64: 8, 128>}]} {
    %c0 = arith.constant 0 : index
    %c0_0 = arith.constant 0 : index
    %0 = vector.load %arg2[%c0, %c0_0] : memref<8x128xf32, #tpu.memory_space<vmem>>, vector<8x128xf32>
    %1 = vector.extract_strided_slice %0 {offsets = [0, 0], sizes = [8, 45], strides = [1, 1]} : vector<8x128xf32> to vector<8x45xf32>
    %2 = vector.extract_strided_slice %0 {offsets = [0, 1], sizes = [8, 45], strides = [1, 1]} : vector<8x128xf32> to vector<8x45xf32>
    %3 = vector.extract_strided_slice %0 {offsets = [0, 2], sizes = [8, 45], strides = [1, 1]} : vector<8x128xf32> to vector<8x45xf32>
    %4 = vector.extract_strided_slice %0 {offsets = [0, 3], sizes = [8, 45], strides = [1, 1]} : vector<8x128xf32> to vector<8x45xf32>
    %5 = vector.extract_strided_slice %0 {offsets = [0, 4], sizes = [8, 45], strides = [1, 1]} : vector<8x128xf32> to vector<8x45xf32>
    %c0_1 = arith.constant 0 : index
    %6 = memref.load %arg1[%c0_1] : memref<64xf32, #tpu.memory_space<smem>>
    %7 = vector.broadcast %6 : f32 to vector<8x45xf32>
    %8 = arith.mulf %1, %7 : vector<8x45xf32>
    %c10 = arith.constant 10 : index
    %9 = memref.load %arg1[%c10] : memref<64xf32, #tpu.memory_space<smem>>
    %10 = vector.broadcast %9 : f32 to vector<8x45xf32>
    %11 = arith.addf %8, %10 : vector<8x45xf32>
    %c1 = arith.constant 1 : index
    %12 = memref.load %arg1[%c1] : memref<64xf32, #tpu.memory_space<smem>>
    %13 = vector.broadcast %12 : f32 to vector<8x45xf32>
    %14 = arith.mulf %2, %13 : vector<8x45xf32>
    %15 = arith.addf %11, %14 : vector<8x45xf32>
    %c2 = arith.constant 2 : index
    %16 = memref.load %arg1[%c2] : memref<64xf32, #tpu.memory_space<smem>>
    %17 = vector.broadcast %16 : f32 to vector<8x45xf32>
    %18 = arith.mulf %3, %17 : vector<8x45xf32>
    %19 = arith.addf %15, %18 : vector<8x45xf32>
    %c3 = arith.constant 3 : index
    %20 = memref.load %arg1[%c3] : memref<64xf32, #tpu.memory_space<smem>>
    %21 = vector.broadcast %20 : f32 to vector<8x45xf32>
    %22 = arith.mulf %4, %21 : vector<8x45xf32>
    %23 = arith.addf %19, %22 : vector<8x45xf32>
    %c4 = arith.constant 4 : index
    %24 = memref.load %arg1[%c4] : memref<64xf32, #tpu.memory_space<smem>>
    %25 = vector.broadcast %24 : f32 to vector<8x45xf32>
    %26 = arith.mulf %5, %25 : vector<8x45xf32>
    %27 = arith.addf %23, %26 : vector<8x45xf32>
    %cst = arith.constant 0.000000e+00 : f32
    %28 = vector.broadcast %cst : f32 to vector<8x45xf32>
    %29 = arith.maximumf %27, %28 : vector<8x45xf32>
    %c5 = arith.constant 5 : index
    %30 = memref.load %arg1[%c5] : memref<64xf32, #tpu.memory_space<smem>>
    %31 = vector.broadcast %30 : f32 to vector<8x45xf32>
    %32 = arith.mulf %1, %31 : vector<8x45xf32>
    %c11 = arith.constant 11 : index
    %33 = memref.load %arg1[%c11] : memref<64xf32, #tpu.memory_space<smem>>
    %34 = vector.broadcast %33 : f32 to vector<8x45xf32>
    %35 = arith.addf %32, %34 : vector<8x45xf32>
    %c6 = arith.constant 6 : index
    %36 = memref.load %arg1[%c6] : memref<64xf32, #tpu.memory_space<smem>>
    %37 = vector.broadcast %36 : f32 to vector<8x45xf32>
    %38 = arith.mulf %2, %37 : vector<8x45xf32>
    %39 = arith.addf %35, %38 : vector<8x45xf32>
    %c7 = arith.constant 7 : index
    %40 = memref.load %arg1[%c7] : memref<64xf32, #tpu.memory_space<smem>>
    %41 = vector.broadcast %40 : f32 to vector<8x45xf32>
    %42 = arith.mulf %3, %41 : vector<8x45xf32>
    %43 = arith.addf %39, %42 : vector<8x45xf32>
    %c8 = arith.constant 8 : index
    %44 = memref.load %arg1[%c8] : memref<64xf32, #tpu.memory_space<smem>>
    %45 = vector.broadcast %44 : f32 to vector<8x45xf32>
    %46 = arith.mulf %4, %45 : vector<8x45xf32>
    %47 = arith.addf %43, %46 : vector<8x45xf32>
    %c9 = arith.constant 9 : index
    %48 = memref.load %arg1[%c9] : memref<64xf32, #tpu.memory_space<smem>>
    %49 = vector.broadcast %48 : f32 to vector<8x45xf32>
    %50 = arith.mulf %5, %49 : vector<8x45xf32>
    %51 = arith.addf %47, %50 : vector<8x45xf32>
    %cst_2 = arith.constant 0.000000e+00 : f32
    %52 = vector.broadcast %cst_2 : f32 to vector<8x45xf32>
    %53 = arith.maximumf %51, %52 : vector<8x45xf32>
    %54 = vector.extract_strided_slice %29 {offsets = [0, 0], sizes = [8, 40], strides = [1, 1]} : vector<8x45xf32> to vector<8x40xf32>
    %55 = vector.extract_strided_slice %29 {offsets = [0, 1], sizes = [8, 40], strides = [1, 1]} : vector<8x45xf32> to vector<8x40xf32>
    %56 = vector.extract_strided_slice %29 {offsets = [0, 2], sizes = [8, 40], strides = [1, 1]} : vector<8x45xf32> to vector<8x40xf32>
    %57 = vector.extract_strided_slice %29 {offsets = [0, 3], sizes = [8, 40], strides = [1, 1]} : vector<8x45xf32> to vector<8x40xf32>
    %58 = vector.extract_strided_slice %29 {offsets = [0, 4], sizes = [8, 40], strides = [1, 1]} : vector<8x45xf32> to vector<8x40xf32>
    %59 = vector.extract_strided_slice %29 {offsets = [0, 5], sizes = [8, 40], strides = [1, 1]} : vector<8x45xf32> to vector<8x40xf32>
    %60 = vector.extract_strided_slice %53 {offsets = [0, 0], sizes = [8, 40], strides = [1, 1]} : vector<8x45xf32> to vector<8x40xf32>
    %61 = vector.extract_strided_slice %53 {offsets = [0, 1], sizes = [8, 40], strides = [1, 1]} : vector<8x45xf32> to vector<8x40xf32>
    %62 = vector.extract_strided_slice %53 {offsets = [0, 2], sizes = [8, 40], strides = [1, 1]} : vector<8x45xf32> to vector<8x40xf32>
    %63 = vector.extract_strided_slice %53 {offsets = [0, 3], sizes = [8, 40], strides = [1, 1]} : vector<8x45xf32> to vector<8x40xf32>
    %64 = vector.extract_strided_slice %53 {offsets = [0, 4], sizes = [8, 40], strides = [1, 1]} : vector<8x45xf32> to vector<8x40xf32>
    %65 = vector.extract_strided_slice %53 {offsets = [0, 5], sizes = [8, 40], strides = [1, 1]} : vector<8x45xf32> to vector<8x40xf32>
    %c12 = arith.constant 12 : index
    %66 = memref.load %arg1[%c12] : memref<64xf32, #tpu.memory_space<smem>>
    %67 = vector.broadcast %66 : f32 to vector<8x40xf32>
    %68 = arith.mulf %54, %67 : vector<8x40xf32>
    %c48 = arith.constant 48 : index
    %69 = memref.load %arg1[%c48] : memref<64xf32, #tpu.memory_space<smem>>
    %70 = vector.broadcast %69 : f32 to vector<8x40xf32>
    %71 = arith.addf %68, %70 : vector<8x40xf32>
    %c13 = arith.constant 13 : index
    %72 = memref.load %arg1[%c13] : memref<64xf32, #tpu.memory_space<smem>>
    %73 = vector.broadcast %72 : f32 to vector<8x40xf32>
    %74 = arith.mulf %55, %73 : vector<8x40xf32>
    %75 = arith.addf %71, %74 : vector<8x40xf32>
    %c14 = arith.constant 14 : index
    %76 = memref.load %arg1[%c14] : memref<64xf32, #tpu.memory_space<smem>>
    %77 = vector.broadcast %76 : f32 to vector<8x40xf32>
    %78 = arith.mulf %56, %77 : vector<8x40xf32>
    %79 = arith.addf %75, %78 : vector<8x40xf32>
    %c15 = arith.constant 15 : index
    %80 = memref.load %arg1[%c15] : memref<64xf32, #tpu.memory_space<smem>>
    %81 = vector.broadcast %80 : f32 to vector<8x40xf32>
    %82 = arith.mulf %57, %81 : vector<8x40xf32>
    %83 = arith.addf %79, %82 : vector<8x40xf32>
    %c16 = arith.constant 16 : index
    %84 = memref.load %arg1[%c16] : memref<64xf32, #tpu.memory_space<smem>>
    %85 = vector.broadcast %84 : f32 to vector<8x40xf32>
    %86 = arith.mulf %58, %85 : vector<8x40xf32>
    %87 = arith.addf %83, %86 : vector<8x40xf32>
    %c17 = arith.constant 17 : index
    %88 = memref.load %arg1[%c17] : memref<64xf32, #tpu.memory_space<smem>>
    %89 = vector.broadcast %88 : f32 to vector<8x40xf32>
    %90 = arith.mulf %59, %89 : vector<8x40xf32>
    %91 = arith.addf %87, %90 : vector<8x40xf32>
    %c18 = arith.constant 18 : index
    %92 = memref.load %arg1[%c18] : memref<64xf32, #tpu.memory_space<smem>>
    %93 = vector.broadcast %92 : f32 to vector<8x40xf32>
    %94 = arith.mulf %60, %93 : vector<8x40xf32>
    %95 = arith.addf %91, %94 : vector<8x40xf32>
    %c19 = arith.constant 19 : index
    %96 = memref.load %arg1[%c19] : memref<64xf32, #tpu.memory_space<smem>>
    %97 = vector.broadcast %96 : f32 to vector<8x40xf32>
    %98 = arith.mulf %61, %97 : vector<8x40xf32>
    %99 = arith.addf %95, %98 : vector<8x40xf32>
    %c20 = arith.constant 20 : index
    %100 = memref.load %arg1[%c20] : memref<64xf32, #tpu.memory_space<smem>>
    %101 = vector.broadcast %100 : f32 to vector<8x40xf32>
    %102 = arith.mulf %62, %101 : vector<8x40xf32>
    %103 = arith.addf %99, %102 : vector<8x40xf32>
    %c21 = arith.constant 21 : index
    %104 = memref.load %arg1[%c21] : memref<64xf32, #tpu.memory_space<smem>>
    %105 = vector.broadcast %104 : f32 to vector<8x40xf32>
    %106 = arith.mulf %63, %105 : vector<8x40xf32>
    %107 = arith.addf %103, %106 : vector<8x40xf32>
    %c22 = arith.constant 22 : index
    %108 = memref.load %arg1[%c22] : memref<64xf32, #tpu.memory_space<smem>>
    %109 = vector.broadcast %108 : f32 to vector<8x40xf32>
    %110 = arith.mulf %64, %109 : vector<8x40xf32>
    %111 = arith.addf %107, %110 : vector<8x40xf32>
    %c23 = arith.constant 23 : index
    %112 = memref.load %arg1[%c23] : memref<64xf32, #tpu.memory_space<smem>>
    %113 = vector.broadcast %112 : f32 to vector<8x40xf32>
    %114 = arith.mulf %65, %113 : vector<8x40xf32>
    %115 = arith.addf %111, %114 : vector<8x40xf32>
    %cst_3 = arith.constant 0.000000e+00 : f32
    %116 = vector.broadcast %cst_3 : f32 to vector<8x40xf32>
    %117 = arith.maximumf %115, %116 : vector<8x40xf32>
    %c24 = arith.constant 24 : index
    %118 = memref.load %arg1[%c24] : memref<64xf32, #tpu.memory_space<smem>>
    %119 = vector.broadcast %118 : f32 to vector<8x40xf32>
    %120 = arith.mulf %54, %119 : vector<8x40xf32>
    %c49 = arith.constant 49 : index
    %121 = memref.load %arg1[%c49] : memref<64xf32, #tpu.memory_space<smem>>
    %122 = vector.broadcast %121 : f32 to vector<8x40xf32>
    %123 = arith.addf %120, %122 : vector<8x40xf32>
    %c25 = arith.constant 25 : index
    %124 = memref.load %arg1[%c25] : memref<64xf32, #tpu.memory_space<smem>>
    %125 = vector.broadcast %124 : f32 to vector<8x40xf32>
    %126 = arith.mulf %55, %125 : vector<8x40xf32>
    %127 = arith.addf %123, %126 : vector<8x40xf32>
    %c26 = arith.constant 26 : index
    %128 = memref.load %arg1[%c26] : memref<64xf32, #tpu.memory_space<smem>>
    %129 = vector.broadcast %128 : f32 to vector<8x40xf32>
    %130 = arith.mulf %56, %129 : vector<8x40xf32>
    %131 = arith.addf %127, %130 : vector<8x40xf32>
    %c27 = arith.constant 27 : index
    %132 = memref.load %arg1[%c27] : memref<64xf32, #tpu.memory_space<smem>>
    %133 = vector.broadcast %132 : f32 to vector<8x40xf32>
    %134 = arith.mulf %57, %133 : vector<8x40xf32>
    %135 = arith.addf %131, %134 : vector<8x40xf32>
    %c28 = arith.constant 28 : index
    %136 = memref.load %arg1[%c28] : memref<64xf32, #tpu.memory_space<smem>>
    %137 = vector.broadcast %136 : f32 to vector<8x40xf32>
    %138 = arith.mulf %58, %137 : vector<8x40xf32>
    %139 = arith.addf %135, %138 : vector<8x40xf32>
    %c29 = arith.constant 29 : index
    %140 = memref.load %arg1[%c29] : memref<64xf32, #tpu.memory_space<smem>>
    %141 = vector.broadcast %140 : f32 to vector<8x40xf32>
    %142 = arith.mulf %59, %141 : vector<8x40xf32>
    %143 = arith.addf %139, %142 : vector<8x40xf32>
    %c30 = arith.constant 30 : index
    %144 = memref.load %arg1[%c30] : memref<64xf32, #tpu.memory_space<smem>>
    %145 = vector.broadcast %144 : f32 to vector<8x40xf32>
    %146 = arith.mulf %60, %145 : vector<8x40xf32>
    %147 = arith.addf %143, %146 : vector<8x40xf32>
    %c31 = arith.constant 31 : index
    %148 = memref.load %arg1[%c31] : memref<64xf32, #tpu.memory_space<smem>>
    %149 = vector.broadcast %148 : f32 to vector<8x40xf32>
    %150 = arith.mulf %61, %149 : vector<8x40xf32>
    %151 = arith.addf %147, %150 : vector<8x40xf32>
    %c32 = arith.constant 32 : index
    %152 = memref.load %arg1[%c32] : memref<64xf32, #tpu.memory_space<smem>>
    %153 = vector.broadcast %152 : f32 to vector<8x40xf32>
    %154 = arith.mulf %62, %153 : vector<8x40xf32>
    %155 = arith.addf %151, %154 : vector<8x40xf32>
    %c33 = arith.constant 33 : index
    %156 = memref.load %arg1[%c33] : memref<64xf32, #tpu.memory_space<smem>>
    %157 = vector.broadcast %156 : f32 to vector<8x40xf32>
    %158 = arith.mulf %63, %157 : vector<8x40xf32>
    %159 = arith.addf %155, %158 : vector<8x40xf32>
    %c34 = arith.constant 34 : index
    %160 = memref.load %arg1[%c34] : memref<64xf32, #tpu.memory_space<smem>>
    %161 = vector.broadcast %160 : f32 to vector<8x40xf32>
    %162 = arith.mulf %64, %161 : vector<8x40xf32>
    %163 = arith.addf %159, %162 : vector<8x40xf32>
    %c35 = arith.constant 35 : index
    %164 = memref.load %arg1[%c35] : memref<64xf32, #tpu.memory_space<smem>>
    %165 = vector.broadcast %164 : f32 to vector<8x40xf32>
    %166 = arith.mulf %65, %165 : vector<8x40xf32>
    %167 = arith.addf %163, %166 : vector<8x40xf32>
    %cst_4 = arith.constant 0.000000e+00 : f32
    %168 = vector.broadcast %cst_4 : f32 to vector<8x40xf32>
    %169 = arith.maximumf %167, %168 : vector<8x40xf32>
    %c36 = arith.constant 36 : index
    %170 = memref.load %arg1[%c36] : memref<64xf32, #tpu.memory_space<smem>>
    %171 = vector.broadcast %170 : f32 to vector<8x40xf32>
    %172 = arith.mulf %54, %171 : vector<8x40xf32>
    %c50 = arith.constant 50 : index
    %173 = memref.load %arg1[%c50] : memref<64xf32, #tpu.memory_space<smem>>
    %174 = vector.broadcast %173 : f32 to vector<8x40xf32>
    %175 = arith.addf %172, %174 : vector<8x40xf32>
    %c37 = arith.constant 37 : index
    %176 = memref.load %arg1[%c37] : memref<64xf32, #tpu.memory_space<smem>>
    %177 = vector.broadcast %176 : f32 to vector<8x40xf32>
    %178 = arith.mulf %55, %177 : vector<8x40xf32>
    %179 = arith.addf %175, %178 : vector<8x40xf32>
    %c38 = arith.constant 38 : index
    %180 = memref.load %arg1[%c38] : memref<64xf32, #tpu.memory_space<smem>>
    %181 = vector.broadcast %180 : f32 to vector<8x40xf32>
    %182 = arith.mulf %56, %181 : vector<8x40xf32>
    %183 = arith.addf %179, %182 : vector<8x40xf32>
    %c39 = arith.constant 39 : index
    %184 = memref.load %arg1[%c39] : memref<64xf32, #tpu.memory_space<smem>>
    %185 = vector.broadcast %184 : f32 to vector<8x40xf32>
    %186 = arith.mulf %57, %185 : vector<8x40xf32>
    %187 = arith.addf %183, %186 : vector<8x40xf32>
    %c40 = arith.constant 40 : index
    %188 = memref.load %arg1[%c40] : memref<64xf32, #tpu.memory_space<smem>>
    %189 = vector.broadcast %188 : f32 to vector<8x40xf32>
    %190 = arith.mulf %58, %189 : vector<8x40xf32>
    %191 = arith.addf %187, %190 : vector<8x40xf32>
    %c41 = arith.constant 41 : index
    %192 = memref.load %arg1[%c41] : memref<64xf32, #tpu.memory_space<smem>>
    %193 = vector.broadcast %192 : f32 to vector<8x40xf32>
    %194 = arith.mulf %59, %193 : vector<8x40xf32>
    %195 = arith.addf %191, %194 : vector<8x40xf32>
    %c42 = arith.constant 42 : index
    %196 = memref.load %arg1[%c42] : memref<64xf32, #tpu.memory_space<smem>>
    %197 = vector.broadcast %196 : f32 to vector<8x40xf32>
    %198 = arith.mulf %60, %197 : vector<8x40xf32>
    %199 = arith.addf %195, %198 : vector<8x40xf32>
    %c43 = arith.constant 43 : index
    %200 = memref.load %arg1[%c43] : memref<64xf32, #tpu.memory_space<smem>>
    %201 = vector.broadcast %200 : f32 to vector<8x40xf32>
    %202 = arith.mulf %61, %201 : vector<8x40xf32>
    %203 = arith.addf %199, %202 : vector<8x40xf32>
    %c44 = arith.constant 44 : index
    %204 = memref.load %arg1[%c44] : memref<64xf32, #tpu.memory_space<smem>>
    %205 = vector.broadcast %204 : f32 to vector<8x40xf32>
    %206 = arith.mulf %62, %205 : vector<8x40xf32>
    %207 = arith.addf %203, %206 : vector<8x40xf32>
    %c45 = arith.constant 45 : index
    %208 = memref.load %arg1[%c45] : memref<64xf32, #tpu.memory_space<smem>>
    %209 = vector.broadcast %208 : f32 to vector<8x40xf32>
    %210 = arith.mulf %63, %209 : vector<8x40xf32>
    %211 = arith.addf %207, %210 : vector<8x40xf32>
    %c46 = arith.constant 46 : index
    %212 = memref.load %arg1[%c46] : memref<64xf32, #tpu.memory_space<smem>>
    %213 = vector.broadcast %212 : f32 to vector<8x40xf32>
    %214 = arith.mulf %64, %213 : vector<8x40xf32>
    %215 = arith.addf %211, %214 : vector<8x40xf32>
    %c47 = arith.constant 47 : index
    %216 = memref.load %arg1[%c47] : memref<64xf32, #tpu.memory_space<smem>>
    %217 = vector.broadcast %216 : f32 to vector<8x40xf32>
    %218 = arith.mulf %65, %217 : vector<8x40xf32>
    %219 = arith.addf %215, %218 : vector<8x40xf32>
    %cst_5 = arith.constant 0.000000e+00 : f32
    %220 = vector.broadcast %cst_5 : f32 to vector<8x40xf32>
    %221 = arith.maximumf %219, %220 : vector<8x40xf32>
    %c0_6 = arith.constant 0 : index
    %c0_7 = arith.constant 0 : index
    %222 = vector.load %arg3[%c0_6, %c0_7] : memref<8x128xf32, #tpu.memory_space<vmem>>, vector<1x40xf32>
    %223 = vector.broadcast %222 : vector<1x40xf32> to vector<8x40xf32>
    %224 = arith.mulf %117, %223 : vector<8x40xf32>
    %c3_8 = arith.constant 3 : index
    %c0_9 = arith.constant 0 : index
    %225 = vector.load %arg3[%c3_8, %c0_9] : memref<8x128xf32, #tpu.memory_space<vmem>>, vector<1x40xf32>
    %226 = vector.broadcast %225 : vector<1x40xf32> to vector<8x40xf32>
    %227 = arith.mulf %117, %226 : vector<8x40xf32>
    %c1_10 = arith.constant 1 : index
    %c0_11 = arith.constant 0 : index
    %228 = vector.load %arg3[%c1_10, %c0_11] : memref<8x128xf32, #tpu.memory_space<vmem>>, vector<1x40xf32>
    %229 = vector.broadcast %228 : vector<1x40xf32> to vector<8x40xf32>
    %230 = arith.mulf %169, %229 : vector<8x40xf32>
    %231 = arith.addf %224, %230 : vector<8x40xf32>
    %c4_12 = arith.constant 4 : index
    %c0_13 = arith.constant 0 : index
    %232 = vector.load %arg3[%c4_12, %c0_13] : memref<8x128xf32, #tpu.memory_space<vmem>>, vector<1x40xf32>
    %233 = vector.broadcast %232 : vector<1x40xf32> to vector<8x40xf32>
    %234 = arith.mulf %169, %233 : vector<8x40xf32>
    %235 = arith.addf %227, %234 : vector<8x40xf32>
    %c2_14 = arith.constant 2 : index
    %c0_15 = arith.constant 0 : index
    %236 = vector.load %arg3[%c2_14, %c0_15] : memref<8x128xf32, #tpu.memory_space<vmem>>, vector<1x40xf32>
    %237 = vector.broadcast %236 : vector<1x40xf32> to vector<8x40xf32>
    %238 = arith.mulf %221, %237 : vector<8x40xf32>
    %239 = arith.addf %231, %238 : vector<8x40xf32>
    %c5_16 = arith.constant 5 : index
    %c0_17 = arith.constant 0 : index
    %240 = vector.load %arg3[%c5_16, %c0_17] : memref<8x128xf32, #tpu.memory_space<vmem>>, vector<1x40xf32>
    %241 = vector.broadcast %240 : vector<1x40xf32> to vector<8x40xf32>
    %242 = arith.mulf %221, %241 : vector<8x40xf32>
    %243 = arith.addf %235, %242 : vector<8x40xf32>
    %cst_18 = arith.constant dense<0.000000e+00> : vector<8xf32>
    %244 = vector.multi_reduction <add>, %239, %cst_18 [1] : vector<8x40xf32> to vector<8xf32>
    %245 = vector.shape_cast %244 : vector<8xf32> to vector<8x1xf32>
    %cst_19 = arith.constant dense<0.000000e+00> : vector<8xf32>
    %246 = vector.multi_reduction <add>, %243, %cst_19 [1] : vector<8x40xf32> to vector<8xf32>
    %247 = vector.shape_cast %246 : vector<8xf32> to vector<8x1xf32>
    %c6_20 = arith.constant 6 : index
    %c0_21 = arith.constant 0 : index
    %248 = vector.load %arg3[%c6_20, %c0_21] : memref<8x128xf32, #tpu.memory_space<vmem>>, vector<1x128xf32>
    %249 = tpu.iota {dimensions = array<i32: 1>} : vector<8x128xi32>
    %c0_i32 = arith.constant 0 : i32
    %250 = vector.broadcast %c0_i32 : i32 to vector<8x128xi32>
    %251 = arith.cmpi eq, %249, %250 : vector<8x128xi32>
    %cst_22 = arith.constant 0.000000e+00 : f32
    %252 = vector.shape_cast %245 : vector<8x1xf32> to vector<8x1xf32>
    %253 = vector.broadcast %252 : vector<8x1xf32> to vector<8x128xf32>
    %254 = vector.broadcast %cst_22 : f32 to vector<8x128xf32>
    %255 = arith.select %251, %253, %254 : vector<8x128xi1>, vector<8x128xf32>
    %256 = vector.broadcast %248 : vector<1x128xf32> to vector<8x128xf32>
    %257 = arith.addf %256, %255 : vector<8x128xf32>
    %c1_i32 = arith.constant 1 : i32
    %258 = vector.broadcast %c1_i32 : i32 to vector<8x128xi32>
    %259 = arith.cmpi eq, %249, %258 : vector<8x128xi32>
    %cst_23 = arith.constant 0.000000e+00 : f32
    %260 = vector.shape_cast %247 : vector<8x1xf32> to vector<8x1xf32>
    %261 = vector.broadcast %260 : vector<8x1xf32> to vector<8x128xf32>
    %262 = vector.broadcast %cst_23 : f32 to vector<8x128xf32>
    %263 = arith.select %259, %261, %262 : vector<8x128xi1>, vector<8x128xf32>
    %264 = arith.addf %257, %263 : vector<8x128xf32>
    %c0_24 = arith.constant 0 : index
    %c0_25 = arith.constant 0 : index
    %265 = vector.load %arg4[%c0_24, %c0_25] : memref<8x128xf32, #tpu.memory_space<vmem>>, vector<8x128xf32>
    tpu.vector_store %arg4[%c0_24, %c0_25], %264 {strides = array<i32>} : memref<8x128xf32, #tpu.memory_space<vmem>>, vector<8x128xf32>,
    return
  }
  func.func @transform_0(%arg0: i32) -> i32 {
    %c0_i32 = arith.constant 0 : i32
    %c0_i32_0 = arith.constant 0 : i32
    return %c0_i32 : i32
  }
  func.func @transform_1(%arg0: i32) -> (i32, i32) {
    %c0_i32 = arith.constant 0 : i32
    %c0_i32_0 = arith.constant 0 : i32
    return %arg0, %c0_i32 : i32, i32
  }
  func.func @transform_2(%arg0: i32) -> (i32, i32) {
    %c0_i32 = arith.constant 0 : i32
    %c0_i32_0 = arith.constant 0 : i32
    %c0_i32_1 = arith.constant 0 : i32
    return %c0_i32, %c0_i32_0 : i32, i32
  }
  func.func @transform_3(%arg0: i32) -> (i32, i32) {
    %c0_i32 = arith.constant 0 : i32
    %c0_i32_0 = arith.constant 0 : i32
    return %arg0, %c0_i32 : i32, i32
  }
}

</mosaic_0001>

<bundles_post_ra>
// kernel: mycnn1d_forward.1
= control target key start
LH: loop header
LB: loop body
LE: loop exit
PB: predicated region body
PF: predicated region fallthrough
CT: control target
= control target key end

     0   :  { %8 = vsyncpa [#allocation3], 0  ;;  %s803_s12 = smov 0   ;;  %s940_s0 = inlined_call_operand.vmem [shape: f32[64], index: 0, kind: input, shape index: {}]   ;;  %s941_s1 = inlined_call_operand.vmem [shape: f32[16,128], index: 1, kind: input, shape index: {}]   ;;  %s942_s2 = inlined_call_operand.vmem [shape: f32[8,128], index: 2, kind: input, shape index: {}]   ;;  %s943_s3 = inlined_call_operand.vmem [shape: f32[16,128], index: 3, kind: output, shape index: {}]  }
   0x1 LB: > { %s658_s13 = sadd.s32 4294967295, %s775_s12   ;;  %p660_p0 = scmp.ge.s32.totalorder %s775_s12, 1  ;;  %s775_s12 = sphi %s803_s12, %s14_s12  }
   0x2   : > { %p113_p1 = scmp.lt.s32.totalorder %s775_s12, 3  ;;  %s126_s16 = sshll.u32 %s940_s0, 4  ;;  %s127_s16 = int_to_ptr.vmem [resolvable:$true] %s126_s16 }
   0x3   : > { %p734_p3 = scmp.eq.s32.totalorder %s658_s13, 0  ;;  %s750_s18 = scalar_lea.vmem %s127_s16, 16 }
   0x4   : > { %p814_p2 = pnand %p660_p0, %p113_p1  ;;  %p751_p6 = scmp.ne.s32.totalorder %s127_s16, %s750_s18 }
   0x5   : > { %p758_p10 = scmp.lt.s32.totalorder %s127_s16, %s127_s16  ;;  %p759_p11 = scmp.lt.s32.totalorder %s750_s18, %s750_s18 }
   0x6   : > { %p730_p4 = pneg %p814_p2 }
   0x7   : > { %p760_p12 = por %p759_p11, %p758_p10 }
   0x8   : > { %p731_p5 = pnand %p734_p3, %p730_p4 }
   0xa   : > { %p752_p7 = pneg %p731_p5 }
   0xc   : > { %p753_p8 = pnand %p752_p7, %p751_p6 }
   0xe   : > { %p754_p9 = pneg %p753_p8 }
  0x10   : > { %p761_p13 = pnand %p760_p12, %p754_p9 }
  0x12   : > { %764 = shalt.err (!%p761_p13)
}
  0x13   : > { %s777_s19 = smov [#allocation2]   ;;  %149 = sbr.rel (%p814_p2) target bundleno = 492 (0x1ec), region = 32 }
  0x14   : > { %733 = dma.vmem_to_smem (!%p731_p5), %s127_s16, 16, %s777_s19, [#allocation3]  }
  0x18   : > { %770 = dma.done.wait (%p734_p3), [#allocation3], 16  }
  0x19   : > { %772 = vsyncadd (%p734_p3), [#allocation3], 4294967280 }
  0x1a   : > { %155 = sfence }
  0x1b   : > { %p172_p0 = scmp.lt.s32.totalorder %s658_s13, 1  ;;  %s668_s20 = sld [smem:[#allocation2 + $0x1]]  ;;  %vm572_vm0 = vcmask 326656  }
  0x1c   : > { %s670_s21 = sld [smem:[#allocation2 + $0x3]]  ;;  %s778_s4 = smov 127  }
  0x1d   : > { %s946_s13 = smov (!%p172_p0, %s658_s13), 1  ;;  %s669_s22 = sld [smem:[#allocation2 + $0x2]] }
  0x1e   : > { %s665_s23 = sshll.u32 %s946_s13, 3  ;;  %s671_s27 = sld [smem:[#allocation2 + $0x4]] }
  0x1f   : > { %s175_s26 = scalar_lea.vmem %s941_s1, %s665_s23  ;;  %s674_s28 = sld [smem:[#allocation2 + $0x6]] }
  0x20   : > { %v180_v0 = vld [vmem:[%s175_s26] sm:$0xff]  ;;  %s675_s29 = sld [smem:[#allocation2 + $0x7]]  ;;  %s779_s6 = smov 125  }
  0x21   : > { %v188_v1 = vstv %s668_s20  ;;  %s676_s30 = sld [smem:[#allocation2 + $0x8]]  ;;  %s780_s7 = smov 126  }
  0x22   : > { %v189_v2 = vmul.f32 %v188_v1, %v180_v0  ;;  %v204_v3 = vstv %s670_s21  ;;  %s677_s5 = sld [smem:[#allocation2 + $0x9]]  ;;  %s781_s8 = smov 124  }
  0x23   : > { %v205_v4 = vmul.f32 %v204_v3, %v180_v0  ;;  %v196_v5 = vstv %s669_s22  ;;  %s181_s9 = sld [smem:[#allocation2]] }
  0x24   : > { %191 = vrot.lane.b32.xlu0 %v189_v2, %s778_s4  ;;  %v197_v6 = vmul.f32 %v196_v5, %v180_v0  ;;  %v212_v7 = vstv %s671_s27  ;;  %s667_s10 = sld [smem:[#allocation2 + $0xa]] }
  0x25   : > { %207 = vrot.lane.b32.xlu1 %v205_v4, %s779_s6  ;;  %v213_v8 = vmul.f32 %v212_v7, %v180_v0  ;;  %v227_v9 = vstv %s674_s28  ;;  %s672_s11 = sld [smem:[#allocation2 + $0x5]] }
  0x26   : > { %v228_v10 = vmul.f32 %v227_v9, %v180_v0  ;;  %v235_v11 = vstv %s675_s29  ;;  %s693_s14 = sld [smem:[#allocation2 + $0x19]] }
  0x27   : > { %v236_v12 = vmul.f32 %v235_v11, %v180_v0  ;;  %v243_v13 = vstv %s676_s30  ;;  %s680_s15 = sld [smem:[#allocation2 + $0xd]] }
  0x28   : > { %199 = vrot.lane.b32.xlu0 %v197_v6, %s780_s7  ;;  %v251_v14 = vstv %s677_s5  ;;  %v244_v15 = vmul.f32 %v243_v13, %v180_v0  ;;  %s673_s16 = sld [smem:[#allocation2 + $0xb]] }
  0x29   : > { %215 = vrot.lane.b32.xlu1 %v213_v8, %s781_s8  ;;  %v252_v16 = vmul.f32 %v251_v14, %v180_v0  ;;  %v182_v17 = vstv %s181_s9  ;;  %s694_s17 = sld [smem:[#allocation2 + $0x1a]] }
  0x2a   : > { %v183_v18 = vmul.f32 %v182_v17, %v180_v0  ;;  %v185_v19 = vstv %s667_s10  ;;  %s681_s18 = sld [smem:[#allocation2 + $0xe]] }
  0x2b   : > { %v221_v28 = vstv %s672_s11  ;;  %s682_s19 = sld [smem:[#allocation2 + $0xf]]  ;;  %s782_s11 = smov 123  }
  0x2c   : > { %230 = vrot.lane.b32.xlu0 %v228_v10, %s778_s4  ;;  %v186_v20 = vadd.f32 %v185_v19, %v183_v18  ;;  %v357_v30 = vstv %s693_s14  ;;  %s706_s20 = sld [smem:[#allocation2 + $0x25]]  ;;  %v222_v33 = vmul.f32 %v221_v28, %v180_v0 }
  0x2d   : > { %238 = vrot.lane.b32.xlu1 %v236_v12, %s780_s7  ;;  %v266_v31 = vstv %s680_s15  ;;  %s707_s21 = sld [smem:[#allocation2 + $0x26]] }
  0x2e   : > { %v224_v34 = vstv %s673_s16  ;;  %s695_s22 = sld [smem:[#allocation2 + $0x1b]] }
  0x2f   : > { %v365_v37 = vstv %s694_s17  ;;  %v225_v39 = vadd.f32 %v224_v34, %v222_v33  ;;  %s696_s24 = sld [smem:[#allocation2 + $0x1c]] }
  0x30   : > { %246 = vrot.lane.b32.xlu0 %v244_v15, %s779_s6  ;;  %v274_v38 = vstv %s681_s18  ;;  %s683_s25 = sld [smem:[#allocation2 + $0x10]] }
  0x31   : > { %254 = vrot.lane.b32.xlu1 %v252_v16, %s781_s8  ;;  %v282_v43 = vstv %s682_s19  ;;  %s684_s26 = sld [smem:[#allocation2 + $0x11]] }
  0x32   : > { %v448_v44 = vstv %s706_s20  ;;  %s708_s27 = sld [smem:[#allocation2 + $0x27]] }
  0x33   : > { %v456_v49 = vstv %s707_s21  ;;  %s709_s28 = sld [smem:[#allocation2 + $0x28]] }
  0x34   : > { %v373_v50 = vstv %s695_s22  ;;  %s697_s29 = sld [smem:[#allocation2 + $0x1d]] }
  0x35   : > { %v381_v55 = vstv %s696_s24  ;;  %s686_s30 = sld [smem:[#allocation2 + $0x13]] }
  0x36   : > { %v290_v56 = vstv %s683_s25  ;;  %s710_s5 = sld [smem:[#allocation2 + $0x29]] }
  0x37   : > { %v298_v61 = vstv %s684_s26  ;;  %s687_s9 = sld [smem:[#allocation2 + $0x14]] }
  0x38   : > { %v464_v62 = vstv %s708_s27  ;;  %s699_s10 = sld [smem:[#allocation2 + $0x1f]] }
  0x39   : > { %v472_v2 = vstv %s709_s28  ;;  %s712_s14 = sld [smem:[#allocation2 + $0x2b]] }
  0x3a   : > { %v389_v3 = vstv %s697_s29  ;;  %s700_s15 = sld [smem:[#allocation2 + $0x20]] }
  0x3b   : > { %v310_v5 = vstv %s686_s30  ;;  %s701_s16 = sld [smem:[#allocation2 + $0x21]] }
  0x3c   : > { %v480_v8 = vstv %s710_s5  ;;  %s688_s17 = sld [smem:[#allocation2 + $0x15]] }
  0x3d   : > { %v318_v11 = vstv %s687_s9  ;;  %s689_s18 = sld [smem:[#allocation2 + $0x16]] }
  0x3e   : > { %v401_v12 = vstv %s699_s10  ;;  %s713_s19 = sld [smem:[#allocation2 + $0x2c]] }
  0x3f   : > { %v492_v15 = vstv %s712_s14  ;;  %s714_s20 = sld [smem:[#allocation2 + $0x2d]] }
  0x40   : > { %v409_v16 = vstv %s700_s15  ;;  %s702_s21 = sld [smem:[#allocation2 + $0x22]] }
  0x41   : > { %v417_v19 = vstv %s701_s16  ;;  %s703_s22 = sld [smem:[#allocation2 + $0x23]] }
  0x42   : > { %s690_s24 = sld [smem:[#allocation2 + $0x17]] }
  0x43   : > { %s716_s25 = sld [smem:[#allocation2 + $0x2f]] }
  0x44   : > { %s679_s26 = sld [smem:[#allocation2 + $0x30]] }
  0x45   : > { %s692_s27 = sld [smem:[#allocation2 + $0x31]] }
  0x46   : > { %v425_v28 = vstv %s702_s21  ;;  %s704_s28 = sld [smem:[#allocation2 + $0x24]] }
  0x47   : > { %s705_s29 = sld [smem:[#allocation2 + $0x32]] }
  0x48   : > { %v342_v33 = vstv %s690_s24  ;;  %s685_s30 = sld [smem:[#allocation2 + $0x12]] }
  0x49   : > { %s711_s5 = sld [smem:[#allocation2 + $0x2a]] }
  0x96   : > { %v192_v21 = vpop.permute.xlu0 %191 }
  0x97   : > { %v208_v22 = vpop.permute.xlu1 %207  ;;  %v194_v23 = vadd.f32 %v192_v21, %v186_v20  ;;  %v326_v20 = vstv %s688_s17 }
  0x9a   : > { %v200_v24 = vpop.permute.xlu0 %199 }
  0x9b   : > { %v202_v25 = vadd.f32 %v200_v24, %v194_v23  ;;  %v216_v26 = vpop.permute.xlu1 %215  ;;  %v334_v23 = vstv %s689_s18  ;;  %v500_v24 = vstv %s713_s19 }
  0x9d   : > { %v210_v27 = vadd.f32 %v208_v22, %v202_v25 }
  0x9e   : > { %v231_v40 = vpop.permute.xlu0 %230 }
  0x9f   : > { %v218_v29 = vadd.f32 %v216_v26, %v210_v27  ;;  %v233_v45 = vadd.f32 %v231_v40, %v225_v39  ;;  %v239_v46 = vpop.permute.xlu1 %238  ;;  %v508_v27 = vstv %s714_s20 }
  0xa1   : > { %v841_v32 = vmax.f32 %v218_v29, 0.0  ;;  %v241_v51 = vadd.f32 %v239_v46, %v233_v45 }
  0xa2   : > { %v247_v52 = vpop.permute.xlu0 %246 }
  0xa3   : > { %v358_v35 = vmul.f32 %v357_v30, %v841_v32  ;;  %v267_v36 = vmul.f32 %v266_v31, %v841_v32  ;;  %v366_v41 = vmul.f32 %v365_v37, %v841_v32  ;;  %v275_v42 = vmul.f32 %v274_v38, %v841_v32  ;;  %v255_v58 = vpop.permute.xlu1 %254 }
  0xa4   : > { %v283_v47 = vmul.f32 %v282_v43, %v841_v32  ;;  %v449_v48 = vmul.f32 %v448_v44, %v841_v32  ;;  %v457_v53 = vmul.f32 %v456_v49, %v841_v32  ;;  %v374_v54 = vmul.f32 %v373_v50, %v841_v32 }
  0xa5   : > { %360 = vrot.lane.b32.xlu1 %v358_v35, %s778_s4  ;;  %269 = vrot.lane.b32.xlu0 %v267_v36, %s778_s4  ;;  %v249_v57 = vadd.f32 %v247_v52, %v241_v51  ;;  %v382_v59 = vmul.f32 %v381_v55, %v841_v32  ;;  %v291_v60 = vmul.f32 %v290_v56, %v841_v32  ;;  %v433_v31 = vstv %s703_s22 }
  0xa6   : > { %v299_v0 = vmul.f32 %v298_v61, %v841_v32  ;;  %v465_v1 = vmul.f32 %v464_v62, %v841_v32  ;;  %v473_v6 = vmul.f32 %v472_v2, %v841_v32  ;;  %v390_v7 = vmul.f32 %v389_v3, %v841_v32 }
  0xa7   : > { %v257_v63 = vadd.f32 %v255_v58, %v249_v57  ;;  %v481_v10 = vmul.f32 %v480_v8, %v841_v32  ;;  %v524_v36 = vstv %s716_s25  ;;  %v354_v52 = vstv %s692_s27 }
  0xa9   : > { %368 = vrot.lane.b32.xlu1 %v366_v41, %s780_s7  ;;  %277 = vrot.lane.b32.xlu0 %v275_v42, %s780_s7  ;;  %v867_v4 = vmax.f32 %v257_v63, 0.0 }
  0xab   : > { %v311_v9 = vmul.f32 %v310_v5, %v867_v4  ;;  %v319_v13 = vmul.f32 %v318_v11, %v867_v4  ;;  %v402_v14 = vmul.f32 %v401_v12, %v867_v4  ;;  %v493_v17 = vmul.f32 %v492_v15, %v867_v4 }
  0xac   : > { %v410_v18 = vmul.f32 %v409_v16, %v867_v4  ;;  %v418_v21 = vmul.f32 %v417_v19, %v867_v4  ;;  %v327_v22 = vmul.f32 %v326_v20, %v867_v4  ;;  %v335_v25 = vmul.f32 %v334_v23, %v867_v4 }
  0xad   : > { %285 = vrot.lane.b32.xlu1 %v283_v47, %s779_s6  ;;  %451 = vrot.lane.b32.xlu0 %v449_v48, %s778_s4  ;;  %v501_v26 = vmul.f32 %v500_v24, %v867_v4  ;;  %v509_v29 = vmul.f32 %v508_v27, %v867_v4  ;;  %v426_v30 = vmul.f32 %v425_v28, %v867_v4  ;;  %v263_v47 = vstv %s679_s26 }
  0xae   : > { %v434_v34 = vmul.f32 %v433_v31, %v867_v4  ;;  %v343_v35 = vmul.f32 %v342_v33, %v867_v4  ;;  %v525_v38 = vmul.f32 %v524_v36, %v867_v4  ;;  %v488_v20 = vstv %s711_s5 }
  0xb1   : > { %459 = vrot.lane.b32.xlu1 %v457_v53, %s780_s7  ;;  %376 = vrot.lane.b32.xlu0 %v374_v54, %s779_s6  ;;  %v442_v53 = vstv %s704_s28 }
  0xb5   : > { %384 = vrot.lane.b32.xlu1 %v382_v59, %s781_s8  ;;  %293 = vrot.lane.b32.xlu0 %v291_v60, %s781_s8  ;;  %v443_v59 = vmul.f32 %v442_v53, %v841_v32  ;;  %v445_v60 = vstv %s705_s29  ;;  %v720_v53 = vld [vmem:[%s942_s2 + $0x4] ss:$0 sm:$0xff] }
  0xb7   : > { %v446_v3 = vadd.f32 %v445_v60, %v443_v59 }
  0xb9   : > { %301 = vrot.lane.b32.xlu1 %v299_v0, %s782_s11  ;;  %467 = vrot.lane.b32.xlu0 %v465_v1, %s779_s6  ;;  %v306_v1 = vstv %s685_s30 }
  0xba   : > { %v307_v11 = vmul.f32 %v306_v1, %v867_v4 }
  0xbd   : > { %475 = vrot.lane.b32.xlu1 %v473_v6, %s781_s8  ;;  %392 = vrot.lane.b32.xlu0 %v390_v7, %s782_s11 }
  0xc1   : > { %313 = vrot.lane.b32.xlu1 %v311_v9, %s778_s4  ;;  %483 = vrot.lane.b32.xlu0 %v481_v10, %s782_s11 }
  0xc5   : > { %321 = vrot.lane.b32.xlu1 %v319_v13, %s780_s7  ;;  %404 = vrot.lane.b32.xlu0 %v402_v14, %s778_s4 }
  0xc9   : > { %495 = vrot.lane.b32.xlu1 %v493_v17, %s778_s4  ;;  %412 = vrot.lane.b32.xlu0 %v410_v18, %s780_s7  ;;  %s715_s4 = sld [smem:[#allocation2 + $0x2e]] }
  0xcd   : > { %420 = vrot.lane.b32.xlu1 %v418_v21, %s779_s6  ;;  %329 = vrot.lane.b32.xlu0 %v327_v22, %s779_s6 }
  0xcf   : > { %v516_v37 = vstv %s715_s4 }
  0xd0   : > { %v517_v39 = vmul.f32 %v516_v37, %v867_v4 }
  0xd1   : > { %337 = vrot.lane.b32.xlu1 %v335_v25, %s781_s8  ;;  %503 = vrot.lane.b32.xlu0 %v501_v26, %s780_s7  ;;  %s691_s7 = sld [smem:[#allocation2 + $0x18]]  ;;  %v489_v26 = vmul.f32 %v488_v20, %v867_v4 }
  0xd5   : > { %511 = vrot.lane.b32.xlu1 %v509_v29, %s779_s6  ;;  %428 = vrot.lane.b32.xlu0 %v426_v30, %s781_s8  ;;  %s678_s6 = sld [smem:[#allocation2 + $0xc]] }
  0xd7   : > { %v351_v46 = vstv %s691_s7  ;;  %s179_s7 = scalar_lea.vmem %s943_s3, %s665_s23 }
  0xd8   : > { %v352_v50 = vmul.f32 %v351_v46, %v841_v32 }
  0xd9   : > { %436 = vrot.lane.b32.xlu1 %v434_v34, %s782_s11  ;;  %345 = vrot.lane.b32.xlu0 %v343_v35, %s782_s11 }
  0xda   : > { %v355_v57 = vadd.f32 %v354_v52, %v352_v50 }
  0xdb   : > { %v260_v42 = vstv %s678_s6 }
  0xdc   : > { %v261_v45 = vmul.f32 %v260_v42, %v841_v32 }
  0xdd   : > { %527 = vrot.lane.b32.xlu1 %v525_v38, %s782_s11  ;;  %519 = vrot.lane.b32.xlu0 %v517_v39, %s781_s8  ;;  %s698_s8 = sld [smem:[#allocation2 + $0x1e]] }
  0xde   : > { %v264_v51 = vadd.f32 %v263_v47, %v261_v45 }
  0xe3   : > { %v397_v12 = vstv %s698_s8 }
  0xe4   : > { %v398_v19 = vmul.f32 %v397_v12, %v867_v4 }
 0x117   : > { %v361_v40 = vpop.permute.xlu1 %360  ;;  %v270_v41 = vpop.permute.xlu0 %269 }
 0x118   : > { %v272_v56 = vadd.f32 %v270_v41, %v264_v51  ;;  %v363_v63 = vadd.f32 %v361_v40, %v355_v57 }
 0x11b   : > { %v369_v43 = vpop.permute.xlu1 %368  ;;  %v278_v44 = vpop.permute.xlu0 %277 }
 0x11c   : > { %v280_v58 = vadd.f32 %v278_v44, %v272_v56  ;;  %v371_v2 = vadd.f32 %v369_v43, %v363_v63 }
 0x11f   : > { %v286_v48 = vpop.permute.xlu1 %285  ;;  %v452_v49 = vpop.permute.xlu0 %451 }
 0x120   : > { %v288_v0 = vadd.f32 %v286_v48, %v280_v58  ;;  %v454_v8 = vadd.f32 %v452_v49, %v446_v3  ;;  %v719_v49 = vld [vmem:[%s942_s2 + $0x1] ss:$0 sm:$0xff] }
 0x123   : > { %v460_v54 = vpop.permute.xlu1 %459  ;;  %v377_v55 = vpop.permute.xlu0 %376 }
 0x124   : > { %v379_v9 = vadd.f32 %v377_v55, %v371_v2  ;;  %v462_v13 = vadd.f32 %v460_v54, %v454_v8  ;;  %v717_v54 = vld [vmem:[%s942_s2] ss:$0 sm:$0xff]  ;;  %v718_v55 = vld [vmem:[%s942_s2 + $0x3] ss:$0 sm:$0xff] }
 0x127   : > { %v385_v61 = vpop.permute.xlu1 %384  ;;  %v294_v62 = vpop.permute.xlu0 %293 }
 0x128   : > { %v296_v5 = vadd.f32 %v294_v62, %v288_v0  ;;  %v387_v32 = vadd.f32 %v385_v61, %v379_v9 }
 0x12b   : > { %v302_v6 = vpop.permute.xlu1 %301  ;;  %v468_v7 = vpop.permute.xlu0 %467 }
 0x12c   : > { %v304_v10 = vadd.f32 %v302_v6, %v296_v5  ;;  %v470_v17 = vadd.f32 %v468_v7, %v462_v13  ;;  %v722_v6 = vld [vmem:[%s942_s2 + $0x5] ss:$0 sm:$0xff]  ;;  %v721_v7 = vld [vmem:[%s942_s2 + $0x2] ss:$0 sm:$0xff] }
 0x12e   : > { %v308_v14 = vadd.f32 %v307_v11, %v304_v10 }
 0x12f   : > { %v476_v15 = vpop.permute.xlu1 %475  ;;  %v393_v16 = vpop.permute.xlu0 %392 }
 0x130   : > { %v395_v18 = vadd.f32 %v393_v16, %v387_v32  ;;  %v478_v21 = vadd.f32 %v476_v15, %v470_v17  ;;  %v723_v16 = vld [vmem:[%s942_s2 + $0x6] ss:$0 sm:$0xff] }
 0x132   : > { %v399_v22 = vadd.f32 %v398_v19, %v395_v18 }
 0x133   : > { %v314_v23 = vpop.permute.xlu1 %313  ;;  %v484_v24 = vpop.permute.xlu0 %483 }
 0x134   : > { %v486_v25 = vadd.f32 %v484_v24, %v478_v21  ;;  %v316_v37 = vadd.f32 %v314_v23, %v308_v14  ;;  %v580_v14 = vlaneseq }
 0x136   : > { %v490_v27 = vadd.f32 %v489_v26, %v486_v25  ;;  %v581_v15 = vand.u32 127, %v580_v14 }
 0x137   : > { %v322_v28 = vpop.permute.xlu1 %321  ;;  %v405_v29 = vpop.permute.xlu0 %404 }
 0x138   : > { %v407_v38 = vadd.f32 %v405_v29, %v399_v22  ;;  %v324_v39 = vadd.f32 %v322_v28, %v316_v37  ;;  %vm582_vm1 = vcmp.eq.s32.totalorder %v581_v15, 0  ;;  %vm589_vm2 = vcmp.eq.s32.totalorder %v581_v15, 1 }
 0x13b   : > { %v496_v30 = vpop.permute.xlu1 %495  ;;  %v413_v31 = vpop.permute.xlu0 %412 }
 0x13c   : > { %v415_v40 = vadd.f32 %v413_v31, %v407_v38  ;;  %v498_v4 = vadd.f32 %v496_v30, %v490_v27 }
 0x13f   : > { %v421_v33 = vpop.permute.xlu1 %420  ;;  %v330_v34 = vpop.permute.xlu0 %329 }
 0x140   : > { %v423_v43 = vadd.f32 %v421_v33, %v415_v40  ;;  %v332_v44 = vadd.f32 %v330_v34, %v324_v39 }
 0x143   : > { %v338_v35 = vpop.permute.xlu1 %337  ;;  %v504_v36 = vpop.permute.xlu0 %503 }
 0x144   : > { %v340_v45 = vadd.f32 %v338_v35, %v332_v44  ;;  %v506_v52 = vadd.f32 %v504_v36, %v498_v4 }
 0x147   : > { %v512_v41 = vpop.permute.xlu1 %511  ;;  %v429_v42 = vpop.permute.xlu0 %428 }
 0x148   : > { %v431_v46 = vadd.f32 %v429_v42, %v423_v43  ;;  %v514_v58 = vadd.f32 %v512_v41, %v506_v52 }
 0x14b   : > { %v437_v47 = vpop.permute.xlu1 %436  ;;  %v346_v48 = vpop.permute.xlu0 %345 }
 0x14c   : > { %v439_v50 = vadd.f32 %v437_v47, %v431_v46  ;;  %v348_v51 = vadd.f32 %v346_v48, %v340_v45 }
 0x14e   : > { %v440_v56 = vmax.f32 %v439_v50, 0.0  ;;  %v349_v57 = vmax.f32 %v348_v51, 0.0 }
 0x14f   : > { %v520_v59 = vpop.permute.xlu0 %519  ;;  %v528_v1 = vpop.permute.xlu1 %527 }
 0x150   : > { %v549_v60 = vmul.f32 %v719_v49, %v440_v56  ;;  %v556_v61 = vmul.f32 %v720_v53, %v440_v56  ;;  %v537_v62 = vmul.f32 %v717_v54, %v349_v57  ;;  %v543_v63 = vmul.f32 %v718_v55, %v349_v57 }
 0x151   : > { %v522_v0 = vadd.f32 %v520_v59, %v514_v58 }
 0x152   : > { %v557_v2 = vadd.f32 %v556_v61, %v543_v63  ;;  %v550_v3 = vadd.f32 %v549_v60, %v537_v62 }
 0x153   : > { %v530_v5 = vadd.f32 %v528_v1, %v522_v0 }
 0x155   : > { %v531_v8 = vmax.f32 %v530_v5, 0.0 }
 0x157   : > { %v570_v9 = vmul.f32 %v722_v6, %v531_v8  ;;  %v563_v10 = vmul.f32 %v721_v7, %v531_v8 }
 0x159   : > { %v571_v11 = vadd.f32 %v570_v9, %v557_v2  ;;  %v564_v12 = vadd.f32 %v563_v10, %v550_v3 }
 0x15b   : > { %v576_v13 = vsel %vm572_vm0, %v571_v11, 0.0  ;;  %v573_v32 = vsel %vm572_vm0, %v564_v12, 0.0 }
 0x15c   : > { %577 = vadd.xlane.f32.xlu1 %v576_v13  ;;  %574 = vadd.xlane.f32.xlu0 %v573_v32 }
 0x1e5   : > { %v578_v17 = vpop.xlane.xlu1 %577  ;;  %v575_v18 = vpop.xlane.xlu0 %574 }
 0x1e6   : > { %v583_v19 = vsel %vm582_vm1, %v575_v18, 0.0  ;;  %v590_v21 = vsel %vm589_vm2, %v578_v17, 0.0 }
 0x1e7   : > { %v588_v20 = vadd.f32 %v723_v16, %v583_v19 }
 0x1e9   : > { %v591_v22 = vadd.f32 %v590_v21, %v588_v20 }
 0x1eb   : > { %592 = vst [vmem:[%s179_s7] sm:$0xff] %v591_v22 }
 0x1ec PF: > { %s14_s12 = sadd.s32 1, %s775_s12  }
 0x1ed   : > { %p11_p1 = scmp.ge.s32.totalorder %s14_s12, 4  }
 0x1ef   :  { %13 = sbr.rel (!%p11_p1) target bundleno = 1 (0x1), region = 67 }
 0x1f4   :  { %612 = vsyncpa [#allocation3], 1 }
 0x1f5   :  { %614 = vsyncpa [#allocation3 + $0x1], 1 }

</bundles_post_ra>
